<compile_context>
chip_gen: v7x
topology: tpu7x:2x2x1
jax: 0.10.0
libtpu: 0.0.40
codegen_flags: <defaults>
</compile_context>

<pallas_src>
import jax
import jax.numpy as jnp
from jax.experimental import pallas as pl
from jax.experimental.pallas import tpu as pltpu

LANES = 128
SUBLANES = 8
# Below this many elements a single fused XLA reduce beats pallas_call overhead.
SMALL_BYPASS_ELEMS = 64 * 1024
VMEM_LIMIT_BYTES = 32 * 1024 * 1024  # explicit limit; largest config uses ~16 MiB


def _round_up(x, m):
    return ((x + m - 1) // m) * m


def _device_defaults():
    """Returns (max_block_rows, num_cores) tuned per TPU generation."""
    try:
        kind = jax.devices()[0].device_kind.lower()
    except Exception:
        kind = ""
    if "v7" in kind:                      # 2 TCs, 3.2 TB/s/TC -> big blocks + 2-way split
        return 8192, 2                    # 4 MiB f32 blocks
    if "v6" in kind:                      # single TC
        return 4096, 1                    # 2 MiB blocks
    if "v5 lite" in kind or "v5e" in kind:
        return 2048, 1                    # 1 MiB blocks (16 MiB scoped default)
    if "v4" in kind or "v5" in kind:      # v4 / v5p megacore
        return 2048, 2
    return 2048, 1


def _make_mse_kernel(rows, block_rows, blocks_per_core, needs_mask):
    """rows / block_rows / blocks_per_core / needs_mask are static Python values."""
    groups = block_rows // SUBLANES  # block_rows is always a multiple of 8

    def _accumulate(p_ref, g_ref, acc_ref, blk, masked):
        # Upcast in VMEM (free VPU slack); keeps native dtype in HBM.
        d = p_ref[...].astype(jnp.float32) - g_ref[...].astype(jnp.float32)
        if masked:
            row_in_blk = jax.lax.broadcasted_iota(jnp.int32, d.shape, 0)
            global_row = blk * block_rows + row_in_blk  # unclamped block index
            d = jnp.where(global_row < rows, d, 0.0)
        sq = d * d
        # Tile-aligned regroup: (block_rows,128) -> (groups,8,128); sum over the
        # leading axis is pure vreg-wise VPU adds into the tiny (8,128) acc.
        acc_ref[...] += jnp.sum(sq.reshape(groups, SUBLANES, LANES), axis=0)

    def kernel(p_ref, g_ref, o_ref, acc_ref):
        c = pl.program_id(0)   # core (parallel) axis
        i = pl.program_id(1)   # reduction (arbitrary) axis

        @pl.when(i == 0)
        def _():
            acc_ref[...] = jnp.zeros_like(acc_ref)

        blk = c * blocks_per_core + i  # logical (unclamped) block index

        if needs_mask:
            # Only the partial last block / clamped extra iterations pay the
            # iota+compare+select; interior blocks take the bare fast path.
            is_partial = (blk + 1) * block_rows > rows

            @pl.when(jnp.logical_not(is_partial))
            def _():
                _accumulate(p_ref, g_ref, acc_ref, blk, masked=False)

            @pl.when(is_partial)
            def _():
                _accumulate(p_ref, g_ref, acc_ref, blk, masked=True)
        else:
            _accumulate(p_ref, g_ref, acc_ref, blk, masked=False)

        @pl.when(i == pl.num_programs(1) - 1)
        def _():
            # Single cross-sublane reduce (8 -> 1); keepdims keeps it 2-D/lane-dense.
            per_lane = jnp.sum(acc_ref[...], axis=0, keepdims=True)  # (1, LANES)
            o_ref[...] = per_lane.reshape(1, 1, LANES)

    return kernel


def supervised_l2_loss(pc_source, pc_target, pred_flow, gt_flow, *, max_block_rows=None):
    """MSELoss(pred_flow, gt_flow) with 'mean' reduction.

    pc_source / pc_target are accepted (to match the PyTorch signature) but
    unused, exactly like the reference module.
    """
    del pc_source, pc_target  # unused in the reference forward

    assert pred_flow.shape == gt_flow.shape
    n_elems = pred_flow.size  # divisor for 'mean' reduction
    out_dtype = pred_flow.dtype

    # Small-input bypass: a fused XLA reduce beats pallas_call launch overhead.
    if n_elems < SMALL_BYPASS_ELEMS:
        d = pred_flow.astype(jnp.float32) - gt_flow.astype(jnp.float32)
        return jnp.mean(d * d).astype(out_dtype)

    p_flat = pred_flow.reshape(-1)
    g_flat = gt_flow.reshape(-1)

    rows = n_elems // LANES                # 128-aligned prefix rows
    tail = n_elems - rows * LANES          # < 128 leftover elements (plain JAX)

    dev_block_rows, dev_cores = _device_defaults()
    if max_block_rows is not None:
        dev_block_rows = max_block_rows

    # Block rows: multiple of 8, never larger than the array's row extent.
    block_rows = min(_round_up(dev_block_rows, SUBLANES), (rows // SUBLANES) * SUBLANES)
    block_rows = max(block_rows, SUBLANES)

    total_blocks = pl.cdiv(rows, block_rows)
    num_cores = max(1, min(dev_cores, total_blocks))
    blocks_per_core = pl.cdiv(total_blocks, num_cores)
    # Mask only emitted when the (core, block) tiling over-covers `rows`.
    needs_mask = (num_cores * blocks_per_core * block_rows) != rows

    p2d = p_flat[: rows * LANES].reshape(rows, LANES)
    g2d = g_flat[: rows * LANES].reshape(rows, LANES)

    def in_index(c, i):
        # Clamp so fully-masked trailing iterations still address a valid block
        # (their contribution is zeroed by the in-kernel row mask).
        blk = jnp.minimum(c * blocks_per_core + i, total_blocks - 1)
        return (blk, 0)

    partials = pl.pallas_call(
        _make_mse_kernel(rows, block_rows, blocks_per_core, needs_mask),
        out_shape=jax.ShapeDtypeStruct((num_cores, 1, LANES), jnp.float32),
        grid_spec=pltpu.PrefetchScalarGridSpec(
            num_scalar_prefetch=0,
            grid=(num_cores, blocks_per_core),
            in_specs=[
                pl.BlockSpec((block_rows, LANES), in_index),
                pl.BlockSpec((block_rows, LANES), in_index),
            ],
            out_specs=pl.BlockSpec((1, 1, LANES), lambda c, i: (c, 0, 0)),
            scratch_shapes=[pltpu.VMEM((SUBLANES, LANES), jnp.float32)],
        ),
        compiler_params=pltpu.CompilerParams(
            dimension_semantics=("parallel", "arbitrary"),
            vmem_limit_bytes=VMEM_LIMIT_BYTES,
        ),
    )(p2d, g2d)

    sq_sum = jnp.sum(partials)  # (num_cores, 1, 128) f32 — trivial wrapper reduce

    if tail:
        pt = p_flat[rows * LANES:].astype(jnp.float32)
        gt_tail = g_flat[rows * LANES:].astype(jnp.float32)
        sq_sum = sq_sum + jnp.sum((pt - gt_tail) ** 2)

    return (sq_sum / jnp.float32(n_elems)).astype(out_dtype)


if __name__ == "__main__":
    key = jax.random.PRNGKey(0)
    k1, k2, k3, k4 = jax.random.split(key, 4)

    # Point-cloud flow shapes: (batch, points, xyz).  n_elems = 72000 is above
    # the bypass threshold and NOT a multiple of 128 (tail = 64 elements).
    B, N, C = 2, 12000, 3
    pc_source = jax.random.normal(k1, (B, N, C), dtype=jnp.float32)
    pc_target = jax.random.normal(k2, (B, N, C), dtype=jnp.float32)
    pred_flow = jax.random.normal(k3, (B, N, C), dtype=jnp.float32)
    gt_flow = jax.random.normal(k4, (B, N, C), dtype=jnp.float32)

    ref = jnp.mean((pred_flow - gt_flow) ** 2)

    # Force small blocks so the multi-block + gated-mask paths are exercised
    # regardless of which TPU generation the default sizing picks.
    loss = supervised_l2_loss(pc_source, pc_target, pred_flow, gt_flow,
                              max_block_rows=256)
    loss = jax.block_until_ready(loss)
    assert jnp.allclose(loss, ref, rtol=1e-5, atol=1e-6), (loss, ref)

    # Default, generation-tuned block sizing.
    loss2 = jax.block_until_ready(
        supervised_l2_loss(pc_source, pc_target, pred_flow, gt_flow))
    assert jnp.allclose(loss2, ref, rtol=1e-5, atol=1e-6), (loss2, ref)

    # Tiny input takes the plain-JAX small-input bypass.
    sk = jax.random.split(key, 4)
    small = [jax.random.normal(k, (2, 128, 3), dtype=jnp.float32) for k in sk]
    loss3 = jax.block_until_ready(supervised_l2_loss(*small))
    ref3 = jnp.mean((small[2] - small[3]) ** 2)
    assert jnp.allclose(loss3, ref3, rtol=1e-6, atol=1e-6), (loss3, ref3)

    print("KERNEL_OK")
</pallas_src>

<mosaic_0001>
module attributes {stable_mosaic.version = 11 : i64} {
  func.func @kernel(%arg0: i32, %arg1: i32, %arg2: memref<256x128xf32, #tpu.memory_space<vmem>>, %arg3: memref<256x128xf32, #tpu.memory_space<vmem>>, %arg4: memref<1x1x128xf32, #tpu.memory_space<vmem>>, %arg5: memref<8x128xf32, #tpu.memory_space<vmem>>) attributes {dimension_semantics = [#tpu.dimension_semantics<parallel>, #tpu.dimension_semantics<arbitrary>], iteration_bounds = array<i64: 1, 3>, scalar_prefetch = 0 : i64, scratch_operands = 1 : i64, tpu.core_type = #tpu.core_type<tc>, window_params = [{transform_indices = @transform_0, window_bounds = array<i64: 256, 128>}, {transform_indices = @transform_1, window_bounds = array<i64: 256, 128>}, {transform_indices = @transform_2, window_bounds = array<i64: 1, 1, 128>}]} {
    %c0_i32 = arith.constant 0 : i32
    %0 = arith.cmpi eq, %arg1, %c0_i32 : i32
    %1 = arith.extui %0 : i1 to i32
    %c0_i32_0 = arith.constant 0 : i32
    %2 = arith.cmpi ne, %1, %c0_i32_0 : i32
    scf.if %2 {
      %cst = arith.constant 0.000000e+00 : f32
      %16 = vector.broadcast %cst : f32 to vector<8x128xf32>
      %c0 = arith.constant 0 : index
      %c0_4 = arith.constant 0 : index
      %17 = vector.load %arg5[%c0, %c0_4] : memref<8x128xf32, #tpu.memory_space<vmem>>, vector<8x128xf32>
      tpu.vector_store %arg5[%c0, %c0_4], %16 {strides = array<i32>} : memref<8x128xf32, #tpu.memory_space<vmem>>, vector<8x128xf32>,
    } else {
    }
    %c3_i32 = arith.constant 3 : i32
    %3 = arith.muli %arg0, %c3_i32 : i32
    %4 = arith.addi %3, %arg1 : i32
    %c1_i32 = arith.constant 1 : i32
    %5 = arith.addi %4, %c1_i32 : i32
    %c256_i32 = arith.constant 256 : i32
    %6 = arith.muli %5, %c256_i32 : i32
    %c562_i32 = arith.constant 562 : i32
    %7 = arith.cmpi sgt, %6, %c562_i32 : i32
    %true = arith.constant true
    %8 = arith.xori %7, %true : i1
    %9 = arith.extui %8 : i1 to i32
    %c0_i32_1 = arith.constant 0 : i32
    %10 = arith.cmpi ne, %9, %c0_i32_1 : i32
    scf.if %10 {
      %c0 = arith.constant 0 : index
      %c0_4 = arith.constant 0 : index
      %16 = vector.load %arg2[%c0, %c0_4] : memref<256x128xf32, #tpu.memory_space<vmem>>, vector<256x128xf32>
      %c0_5 = arith.constant 0 : index
      %c0_6 = arith.constant 0 : index
      %17 = vector.load %arg3[%c0_5, %c0_6] : memref<256x128xf32, #tpu.memory_space<vmem>>, vector<256x128xf32>
      %18 = arith.subf %16, %17 : vector<256x128xf32>
      %19 = arith.mulf %18, %18 : vector<256x128xf32>
      %c0_7 = arith.constant 0 : index
      %c0_8 = arith.constant 0 : index
      %20 = vector.load %arg5[%c0_7, %c0_8] : memref<8x128xf32, #tpu.memory_space<vmem>>, vector<8x128xf32>
      %21 = vector.shape_cast %19 : vector<256x128xf32> to vector<32x8x128xf32>
      %cst = arith.constant dense<0.000000e+00> : vector<8x128xf32>
      %22 = vector.multi_reduction <add>, %21, %cst [0] : vector<32x8x128xf32> to vector<8x128xf32>
      %23 = arith.addf %20, %22 : vector<8x128xf32>
      %c0_9 = arith.constant 0 : index
      %c0_10 = arith.constant 0 : index
      %24 = vector.load %arg5[%c0_9, %c0_10] : memref<8x128xf32, #tpu.memory_space<vmem>>, vector<8x128xf32>
      tpu.vector_store %arg5[%c0_9, %c0_10], %23 {strides = array<i32>} : memref<8x128xf32, #tpu.memory_space<vmem>>, vector<8x128xf32>,
    } else {
    }
    %11 = arith.extui %7 : i1 to i32
    %c0_i32_2 = arith.constant 0 : i32
    %12 = arith.cmpi ne, %11, %c0_i32_2 : i32
    scf.if %12 {
      %c0 = arith.constant 0 : index
      %c0_4 = arith.constant 0 : index
      %16 = vector.load %arg2[%c0, %c0_4] : memref<256x128xf32, #tpu.memory_space<vmem>>, vector<256x128xf32>
      %c0_5 = arith.constant 0 : index
      %c0_6 = arith.constant 0 : index
      %17 = vector.load %arg3[%c0_5, %c0_6] : memref<256x128xf32, #tpu.memory_space<vmem>>, vector<256x128xf32>
      %18 = arith.subf %16, %17 : vector<256x128xf32>
      %19 = tpu.iota {dimensions = array<i32: 0>} : vector<256x128xi32>
      %c256_i32_7 = arith.constant 256 : i32
      %20 = arith.muli %4, %c256_i32_7 : i32
      %21 = vector.broadcast %20 : i32 to vector<256x128xi32>
      %22 = arith.addi %21, %19 : vector<256x128xi32>
      %c562_i32_8 = arith.constant 562 : i32
      %23 = vector.broadcast %c562_i32_8 : i32 to vector<256x128xi32>
      %24 = arith.cmpi slt, %22, %23 : vector<256x128xi32>
      %cst = arith.constant 0.000000e+00 : f32
      %25 = vector.broadcast %cst : f32 to vector<256x128xf32>
      %26 = arith.select %24, %18, %25 : vector<256x128xi1>, vector<256x128xf32>
      %27 = arith.mulf %26, %26 : vector<256x128xf32>
      %c0_9 = arith.constant 0 : index
      %c0_10 = arith.constant 0 : index
      %28 = vector.load %arg5[%c0_9, %c0_10] : memref<8x128xf32, #tpu.memory_space<vmem>>, vector<8x128xf32>
      %29 = vector.shape_cast %27 : vector<256x128xf32> to vector<32x8x128xf32>
      %cst_11 = arith.constant dense<0.000000e+00> : vector<8x128xf32>
      %30 = vector.multi_reduction <add>, %29, %cst_11 [0] : vector<32x8x128xf32> to vector<8x128xf32>
      %31 = arith.addf %28, %30 : vector<8x128xf32>
      %c0_12 = arith.constant 0 : index
      %c0_13 = arith.constant 0 : index
      %32 = vector.load %arg5[%c0_12, %c0_13] : memref<8x128xf32, #tpu.memory_space<vmem>>, vector<8x128xf32>
      tpu.vector_store %arg5[%c0_12, %c0_13], %31 {strides = array<i32>} : memref<8x128xf32, #tpu.memory_space<vmem>>, vector<8x128xf32>,
    } else {
    }
    %c2_i32 = arith.constant 2 : i32
    %13 = arith.cmpi eq, %arg1, %c2_i32 : i32
    %14 = arith.extui %13 : i1 to i32
    %c0_i32_3 = arith.constant 0 : i32
    %15 = arith.cmpi ne, %14, %c0_i32_3 : i32
    scf.if %15 {
      %c0 = arith.constant 0 : index
      %c0_4 = arith.constant 0 : index
      %16 = vector.load %arg5[%c0, %c0_4] : memref<8x128xf32, #tpu.memory_space<vmem>>, vector<8x128xf32>
      %cst = arith.constant dense<0.000000e+00> : vector<128xf32>
      %17 = vector.multi_reduction <add>, %16, %cst [0] : vector<8x128xf32> to vector<128xf32>
      %18 = vector.shape_cast %17 : vector<128xf32> to vector<1x128xf32>
      %19 = vector.shape_cast %18 : vector<1x128xf32> to vector<1x1x128xf32>
      %c0_5 = arith.constant 0 : index
      %c0_6 = arith.constant 0 : index
      %c0_7 = arith.constant 0 : index
      %20 = vector.load %arg4[%c0_5, %c0_6, %c0_7] : memref<1x1x128xf32, #tpu.memory_space<vmem>>, vector<1x1x128xf32>
      tpu.vector_store %arg4[%c0_5, %c0_6, %c0_7], %19 {strides = array<i32>} : memref<1x1x128xf32, #tpu.memory_space<vmem>>, vector<1x1x128xf32>,
    } else {
    }
    return
  }
  func.func @transform_0(%arg0: i32, %arg1: i32) -> (i32, i32) {
    %c3_i32 = arith.constant 3 : i32
    %0 = arith.muli %arg0, %c3_i32 : i32
    %1 = arith.addi %0, %arg1 : i32
    %c2_i32 = arith.constant 2 : i32
    %2 = arith.minsi %1, %c2_i32 : i32
    %c0_i32 = arith.constant 0 : i32
    %c0_i32_0 = arith.constant 0 : i32
    return %2, %c0_i32 : i32, i32
  }
  func.func @transform_1(%arg0: i32, %arg1: i32) -> (i32, i32) {
    %c3_i32 = arith.constant 3 : i32
    %0 = arith.muli %arg0, %c3_i32 : i32
    %1 = arith.addi %0, %arg1 : i32
    %c2_i32 = arith.constant 2 : i32
    %2 = arith.minsi %1, %c2_i32 : i32
    %c0_i32 = arith.constant 0 : i32
    %c0_i32_0 = arith.constant 0 : i32
    return %2, %c0_i32 : i32, i32
  }
  func.func @transform_2(%arg0: i32, %arg1: i32) -> (i32, i32, i32) {
    %c0_i32 = arith.constant 0 : i32
    %c0_i32_0 = arith.constant 0 : i32
    %c0_i32_1 = arith.constant 0 : i32
    return %arg0, %c0_i32, %c0_i32_0 : i32, i32, i32
  }
}

</mosaic_0001>

<bundles_post_ra>
// kernel: tpu_custom_call.1
= control target key start
LH: loop header
LB: loop body
LE: loop exit
PB: predicated region body
PF: predicated region fallthrough
CT: control target
= control target key end

     0   :  { %7 = vsyncpa [#allocation4], 0  ;;  %s1513_s0 = inlined_call_operand.hbm [shape: f32[562,128], index: 0, kind: input, shape index: {}]   ;;  %s1514_s1 = inlined_call_operand.hbm [shape: f32[562,128], index: 1, kind: input, shape index: {}]   ;;  %s1515_s2 = inlined_call_operand.hbm [shape: f32[1,1,128], index: 2, kind: output, shape index: {}]  }
   0x1   :  { %9 = vsyncpa [#allocation4 + $0x1], 0 }
   0x2   :  { %10 = vsyncpa [#allocation7], 0 }
   0x3   :  { %12 = vsyncpa [#allocation7 + $0x1], 0 }
   0x4   :  { %13 = vsyncpa [#allocation5], 0  ;;  %s1099_s9 = smov 0   ;;  %s1101_s10 = smov 0  }
   0x5   :  { %s1103_s11 = smov 0   ;;  %s1105_s12 = smov 0  }
   0x6   :  { %s1107_s13 = smov 0   ;;  %s1109_s14 = smov 0  }
   0x7 LB: > { %s28_s15 = sadd.s32 1, %s1070_s13  ;;  %p37_p1 = scmp.lt.s32.totalorder %s1070_s13, 2  ;;  %s1074_s14 = sphi %s1109_s14, %s19_s14   ;;  %s1070_s13 = sphi %s1107_s13, %s1523_s13   ;;  %s1066_s12 = sphi %s1105_s12, %s1522_s12   ;;  %s1062_s11 = sphi %s1103_s11, %s1521_s11   ;;  %s1058_s10 = sphi %s1101_s10, %s1520_s10   ;;  %s1054_s9 = sphi %s1099_s9, %s1519_s9  }
   0x8   : > { %p29_p0 = scmp.ge.s32.totalorder %s28_s15, 3  ;;  %s838_s16 = sadd.s32 4294967295, %s1074_s14  }
   0x9   : > { %p53_p2 = scmp.ne.s32.totalorder %s1062_s11, %s1058_s10  ;;  %p54_p4 = scmp.eq.s32.totalorder %s1074_s14, 0 }
   0xa   : > { %s1525_s15 = smov (%p29_p0, %s28_s15), 0  ;;  %p59_p5 = scmp.ne.s32.totalorder %s1058_s10, %s1054_s9 }
   0xb   : > { %s1135_s17 = scalar_select %p37_p1, %s1070_s13, 2 }
   0xc   : > { %p41_p3 = scmp.lt.s32.totalorder %s1525_s15, 2  ;;  %p60_p6 = scmp.eq.s32.totalorder %s838_s16, 0 }
   0xd   : > { %p1143_p7 = por %p54_p4, %p53_p2  ;;  %s46_s22 = sadd.s32 1, %s1062_s11 }
   0xe   : > { %s42_s18 = scalar_select %p41_p3, %s1525_s15, 2 }
   0xf   : > { %p1147_p8 = por %p60_p6, %p59_p5  ;;  %p840_p10 = scmp.ge.s32.totalorder %s1074_s14, 3 }
  0x10   : > { %s43_s21 = ssub.s32 %s1135_s17, %s42_s18 }
  0x11   : > { %p44_p9 = scmp.eq.s32.totalorder %s43_s21, 0  ;;  %139 = sbr.rel (%p840_p10) target bundleno = 94 (0x5e), region = 16 }
  0x13   : > { %s1154_s23 = scalar_select %p44_p9, %s1062_s11, %s46_s22  }
  0x18   : > { %142 = sbr.rel (!%p1143_p7) target bundleno = 59 (0x3b), region = 20  ;;  %s143_s24 = sand.u32 (%p1143_p7), 1, %s1062_s11  }
  0x19   : > { %s842_s25 = sshll.u32 (%p1143_p7), %s1135_s17, 5  ;;  %s841_s26 = sshll.u32 (%p1143_p7), %s143_s24, 8 }
  0x1a   : > { %s153_s27 = ssub.s32 (%p1143_p7), 71, %s842_s25  ;;  %s1164_s30 = scalar_lea.sflag (%p1143_p7), [#allocation4], %s143_s24 }
  0x1b   : > { %p154_p11 = scmp.lt.s32.totalorder (%p1143_p7), %s153_s27, 32  ;;  %s147_s3 = scalar_lea.vmem (%p1143_p7), [#allocation3], %s841_s26 }
  0x1f   : > { %s1527_s27 = smov (!%p154_p11, %s153_s27), 32 }
  0x20   : > { %s1161_s28 = sshll.u32 %s1527_s27, 7 }
  0x21   : > { %s158_s29 = ssub.s32 4096, %s1161_s28 }
  0x22   : > { %159 = vsyncadd %s1164_s30, %s158_s29  ;;  %p844_p12 = scmp.ne.s32.totalorder %s1161_s28, 0  ;;  %s868_s4 = sshll.u32 %s1135_s17, 12 }
  0x23   : > { %s1172_s7 = scalar_lea.hbm %s1513_s0, %s868_s4  ;;  %s164_s8 = sshll.u32 %s147_s3, 4  ;;  %s1174_s8 = int_to_ptr.vmem [resolvable:$true] %s164_s8 }
  0x24   : > { %s934_s9 = scalar_lea.hbm %s1172_s7, %s1161_s28  ;;  %s938_s22 = scalar_lea.hbm %s1513_s0, 9088 }
  0x25   : > { %p935_p13 = scmp.ne.s32.totalorder %s1172_s7, %s934_s9  ;;  %p939_p2 = scmp.lt.u32.totalorder %s1172_s7, %s1513_s0 }
  0x26   : > { %p940_p3 = scmp.lt.u32.totalorder %s938_s22, %s934_s9  ;;  %p942_p5 = scmp.lt.u32.totalorder %s934_s9, %s1172_s7 }
  0x27   : > { %p936_p0 = pnand %p935_p13, %p844_p12 }
  0x28   : > { %p941_p4 = por %p940_p3, %p939_p2 }
  0x29   : > { %p937_p1 = pneg %p936_p0 }
  0x2a   : > { %p943_p6 = por %p942_p5, %p941_p4 }
  0x2c   : > { %p944_p9 = pnand %p943_p6, %p937_p1 }
  0x2e   : > { %947 = shalt.err (!%p944_p9)
}
  0x2f   : > { %s948_s26 = scalar_lea.vmem %s1174_s8, %s1161_s28  ;;  %s1076_s27 = smov [#allocation3]  }
  0x30   : > { %p949_p10 = scmp.ne.s32.totalorder %s1174_s8, %s948_s26  ;;  %s952_s29 = sshll.u32 %s1076_s27, 4  ;;  %s953_s29 = int_to_ptr.vmem [resolvable:$false] %s952_s29 }
  0x31   : > { %s954_s3 = scalar_lea.vmem %s953_s29, 8192  ;;  %p955_p0 = scmp.lt.s32.totalorder %s1174_s8, %s953_s29 }
  0x32   : > { %p950_p11 = pnand %p949_p10, %p844_p12  ;;  %p956_p2 = scmp.lt.s32.totalorder %s954_s3, %s948_s26 }
  0x34   : > { %p951_p13 = pneg %p950_p11  ;;  %p957_p3 = por %p956_p2, %p955_p0 }
  0x36   : > { %p958_p4 = pnand %p957_p3, %p951_p13 }
  0x38   : > { %961 = shalt.err (!%p958_p4)
}
  0x39   : > { %s1077_s4 = smov 128   ;;  %s1078_s5 = smov 8  }
  0x3a   : > { %170 = dma.hbm_to_vmem [thread:$0]  (%p844_p12), %s1172_s7, %s1161_s28, %s1174_s8, %s1164_s30, %s1077_s4, %s1077_s4, %s1078_s5  }
  0x3b PF: > { %173 = sbr.rel (!%p1143_p7) target bundleno = 94 (0x5e), region = 24  ;;  %s174_s6 = sand.u32 (%p1143_p7), 1, %s1062_s11  }
  0x3c   : > { %s849_s9 = sshll.u32 (%p1143_p7), %s1135_s17, 5  ;;  %s848_s18 = sshll.u32 (%p1143_p7), %s174_s6, 8 }
  0x3d   : > { %s184_s21 = ssub.s32 (%p1143_p7), 71, %s849_s9  ;;  %s1208_s25 = scalar_lea.sflag (%p1143_p7), [#allocation7], %s174_s6 }
  0x3e   : > { %p185_p1 = scmp.lt.s32.totalorder (%p1143_p7), %s184_s21, 32  ;;  %s178_s28 = scalar_lea.vmem (%p1143_p7), [#allocation6], %s848_s18 }
  0x42   : > { %s1529_s21 = smov (!%p185_p1, %s184_s21), 32 }
  0x43   : > { %s1205_s22 = sshll.u32 %s1529_s21, 7 }
  0x44   : > { %s189_s24 = ssub.s32 4096, %s1205_s22 }
  0x45   : > { %190 = vsyncadd %s1208_s25, %s189_s24  ;;  %p851_p7 = scmp.ne.s32.totalorder %s1205_s22, 0  ;;  %s869_s19 = sshll.u32 %s1135_s17, 12 }
  0x46   : > { %s1216_s8 = scalar_lea.hbm %s1514_s1, %s869_s19  ;;  %s195_s26 = sshll.u32 %s178_s28, 4  ;;  %s1218_s26 = int_to_ptr.vmem [resolvable:$true] %s195_s26 }
  0x47   : > { %s962_s27 = scalar_lea.hbm %s1216_s8, %s1205_s22  ;;  %s966_s17 = scalar_lea.hbm %s1514_s1, 9088 }
  0x48   : > { %p963_p12 = scmp.ne.s32.totalorder %s1216_s8, %s962_s27  ;;  %p967_p9 = scmp.lt.u32.totalorder %s1216_s8, %s1514_s1 }
  0x49   : > { %p968_p10 = scmp.lt.u32.totalorder %s966_s17, %s962_s27  ;;  %p970_p13 = scmp.lt.u32.totalorder %s962_s27, %s1216_s8 }
  0x4a   : > { %p964_p5 = pnand %p963_p12, %p851_p7 }
  0x4b   : > { %p969_p11 = por %p968_p10, %p967_p9 }
  0x4c   : > { %p965_p6 = pneg %p964_p5 }
  0x4d   : > { %p971_p0 = por %p970_p13, %p969_p11 }
  0x4f   : > { %p972_p2 = pnand %p971_p0, %p965_p6 }
  0x51   : > { %975 = shalt.err (!%p972_p2)
}
  0x52   : > { %s976_s6 = scalar_lea.vmem %s1218_s26, %s1205_s22  ;;  %s1079_s9 = smov [#allocation6]  }
  0x53   : > { %p977_p3 = scmp.ne.s32.totalorder %s1218_s26, %s976_s6  ;;  %s980_s18 = sshll.u32 %s1079_s9, 4  ;;  %s981_s18 = int_to_ptr.vmem [resolvable:$false] %s980_s18 }
  0x54   : > { %s982_s21 = scalar_lea.vmem %s981_s18, 8192  ;;  %p983_p12 = scmp.lt.s32.totalorder %s1218_s26, %s981_s18 }
  0x55   : > { %p978_p4 = pnand %p977_p3, %p851_p7  ;;  %p984_p5 = scmp.lt.s32.totalorder %s982_s21, %s976_s6 }
  0x57   : > { %p979_p1 = pneg %p978_p4  ;;  %p985_p9 = por %p984_p5, %p983_p12 }
  0x59   : > { %p986_p10 = pnand %p985_p9, %p979_p1 }
  0x5b   : > { %989 = shalt.err (!%p986_p10)
}
  0x5c   : > { %s1080_s24 = smov 128   ;;  %s1081_s28 = smov 8  }
  0x5d   : > { %201 = dma.hbm_to_vmem [thread:$0]  (%p851_p7), %s1216_s8, %s1205_s22, %s1218_s26, %s1208_s25, %s1080_s24, %s1080_s24, %s1081_s28  }
  0x5e PF: > { %p855_p6 = scmp.ge.s32.totalorder %s1074_s14, 1  ;;  %p203_p11 = scmp.lt.s32.totalorder %s1074_s14, 4 }
  0x60   : > { %p204_p13 = pnand %p855_p6, %p203_p11 }
  0x61   : > { %s209_s19 = sand.u32 (!%p204_p13), 1, %s1058_s10  }
  0x62   : > { %207 = sbr.rel (%p204_p13) target bundleno = 315 (0x13b), region = 28  ;;  %s856_s30 = sshll.u32 (!%p204_p13), %s209_s19, 8 }
  0x63   : > { %s210_s7 = scalar_lea.sflag (!%p204_p13), [#allocation4], %s209_s19  ;;  %s1248_s27 = scalar_lea.vmem (!%p204_p13), [#allocation3], %s856_s30 }
  0x69   : > { %1041 = dma.done.wait (%p1147_p8), %s210_s7, 4096  }
  0x6a   : > { %1043 = vsyncadd (%p1147_p8), %s210_s7, 4294963200  ;;  %s219_s22 = scalar_lea.sflag [#allocation7], %s209_s19  ;;  %s1254_s25 = scalar_lea.vmem [#allocation6], %s856_s30 }
  0x6b   : > { %1045 = dma.done.wait (%p1147_p8), %s219_s22, 4096  }
  0x6c   : > { %1047 = vsyncadd (%p1147_p8), %s219_s22, 4294963200  ;;  %p858_p7 = scmp.ne.s32.totalorder %s1066_s12, 0 }
  0x6d   : > { %v1082_v0 = vmov (!%p858_p7), 0.0  }
  0x6e   : > { %264 = sbr.rel (%p858_p7) target bundleno = 117 (0x75), region = 40  ;;  %265 = vst [vmem:[#allocation2] sm:$0xff] (!%p858_p7), %v1082_v0 }
  0x75 PF: > { %s870_s8 = sshll.u32 %s1066_s12, 8 }
  0x76   : > { %s1264_s26 = sadd.s32 256, %s870_s8 }
  0x77   : > { %p860_p0 = scmp.gt.s32.totalorder %s1264_s26, 562 }
  0x78   : > { %v275_v1 = vld [vmem:[%s1248_s27] sm:$0xff] (!%p860_p0)  ;;  %v276_v2 = vld [vmem:[%s1248_s27 + $0x8] sm:$0xff] (!%p860_p0)  ;;  %v277_v5 = vld [vmem:[%s1248_s27 + $0x10] sm:$0xff] (!%p860_p0) }
  0x79   : > { %274 = sbr.rel (%p860_p0) target bundleno = 191 (0xbf), region = 44  ;;  %v307_v3 = vld [vmem:[%s1254_s25] sm:$0xff] (!%p860_p0)  ;;  %v308_v4 = vld [vmem:[%s1254_s25 + $0x8] sm:$0xff] (!%p860_p0)  ;;  %v309_v6 = vld [vmem:[%s1254_s25 + $0x10] sm:$0xff] (!%p860_p0) }
  0x7a   : > { %v339_v7 = vsub.f32 (!%p860_p0), %v275_v1, %v307_v3  ;;  %v340_v8 = vsub.f32 (!%p860_p0), %v276_v2, %v308_v4  ;;  %v278_v9 = vld [vmem:[%s1248_s27 + $0x18] sm:$0xff] (!%p860_p0)  ;;  %v341_v11 = vsub.f32 (!%p860_p0), %v277_v5, %v309_v6  ;;  %v279_v12 = vld [vmem:[%s1248_s27 + $0x20] sm:$0xff] (!%p860_p0)  ;;  %v280_v17 = vld [vmem:[%s1248_s27 + $0x28] sm:$0xff] (!%p860_p0) }
  0x7b   : > { %v310_v10 = vld [vmem:[%s1254_s25 + $0x18] sm:$0xff] (!%p860_p0)  ;;  %v311_v13 = vld [vmem:[%s1254_s25 + $0x20] sm:$0xff] (!%p860_p0)  ;;  %v312_v18 = vld [vmem:[%s1254_s25 + $0x28] sm:$0xff] (!%p860_p0) }
  0x7c   : > { %v342_v14 = vsub.f32 (!%p860_p0), %v278_v9, %v310_v10  ;;  %v371_v15 = vmul.f32 (!%p860_p0), %v339_v7, %v339_v7  ;;  %v372_v16 = vmul.f32 (!%p860_p0), %v340_v8, %v340_v8  ;;  %v343_v19 = vsub.f32 (!%p860_p0), %v279_v12, %v311_v13  ;;  %v281_v21 = vld [vmem:[%s1248_s27 + $0x30] sm:$0xff] (!%p860_p0)  ;;  %v282_v26 = vld [vmem:[%s1248_s27 + $0x38] sm:$0xff] (!%p860_p0)  ;;  %v283_v31 = vld [vmem:[%s1248_s27 + $0x40] sm:$0xff] (!%p860_p0) }
  0x7d   : > { %v373_v20 = vmul.f32 (!%p860_p0), %v341_v11, %v341_v11  ;;  %v313_v22 = vld [vmem:[%s1254_s25 + $0x30] sm:$0xff] (!%p860_p0)  ;;  %v344_v23 = vsub.f32 (!%p860_p0), %v280_v17, %v312_v18  ;;  %v314_v27 = vld [vmem:[%s1254_s25 + $0x38] sm:$0xff] (!%p860_p0)  ;;  %v315_v32 = vld [vmem:[%s1254_s25 + $0x40] sm:$0xff] (!%p860_p0) }
  0x7e   : > { %v374_v24 = vmul.f32 (!%p860_p0), %v342_v14, %v342_v14  ;;  %v404_v25 = vadd.f32 (!%p860_p0), %v372_v16, %v371_v15  ;;  %v345_v28 = vsub.f32 (!%p860_p0), %v281_v21, %v313_v22  ;;  %v375_v29 = vmul.f32 (!%p860_p0), %v343_v19, %v343_v19  ;;  %v284_v36 = vld [vmem:[%s1248_s27 + $0x48] sm:$0xff] (!%p860_p0)  ;;  %v285_v41 = vld [vmem:[%s1248_s27 + $0x50] sm:$0xff] (!%p860_p0)  ;;  %v286_v46 = vld [vmem:[%s1248_s27 + $0x58] sm:$0xff] (!%p860_p0) }
  0x7f   : > { %v346_v33 = vsub.f32 (!%p860_p0), %v282_v26, %v314_v27  ;;  %v376_v34 = vmul.f32 (!%p860_p0), %v344_v23, %v344_v23  ;;  %v316_v37 = vld [vmem:[%s1254_s25 + $0x48] sm:$0xff] (!%p860_p0)  ;;  %v347_v38 = vsub.f32 (!%p860_p0), %v283_v31, %v315_v32  ;;  %v317_v42 = vld [vmem:[%s1254_s25 + $0x50] sm:$0xff] (!%p860_p0)  ;;  %v318_v47 = vld [vmem:[%s1254_s25 + $0x58] sm:$0xff] (!%p860_p0) }
  0x80   : > { %v405_v30 = vadd.f32 %v404_v25, %v373_v20  ;;  %v377_v39 = vmul.f32 %v345_v28, %v345_v28  ;;  %v348_v43 = vsub.f32 %v284_v36, %v316_v37  ;;  %v349_v48 = vsub.f32 %v285_v41, %v317_v42  ;;  %v287_v51 = vld [vmem:[%s1248_s27 + $0x60] sm:$0xff]  ;;  %v288_v56 = vld [vmem:[%s1248_s27 + $0x68] sm:$0xff]  ;;  %v289_v61 = vld [vmem:[%s1248_s27 + $0x70] sm:$0xff] }
  0x81   : > { %v378_v44 = vmul.f32 %v346_v33, %v346_v33  ;;  %v379_v49 = vmul.f32 %v347_v38, %v347_v38  ;;  %v319_v52 = vld [vmem:[%s1254_s25 + $0x60] sm:$0xff]  ;;  %v350_v53 = vsub.f32 %v286_v46, %v318_v47  ;;  %v320_v57 = vld [vmem:[%s1254_s25 + $0x68] sm:$0xff]  ;;  %v321_v62 = vld [vmem:[%s1254_s25 + $0x70] sm:$0xff] }
  0x82   : > { %v406_v35 = vadd.f32 %v405_v30, %v374_v24  ;;  %v380_v54 = vmul.f32 %v348_v43, %v348_v43  ;;  %v351_v58 = vsub.f32 %v287_v51, %v319_v52  ;;  %v381_v59 = vmul.f32 %v349_v48, %v349_v48  ;;  %v290_v2 = vld [vmem:[%s1248_s27 + $0x78] sm:$0xff]  ;;  %v291_v7 = vld [vmem:[%s1248_s27 + $0x80] sm:$0xff]  ;;  %v292_v12 = vld [vmem:[%s1248_s27 + $0x88] sm:$0xff] }
  0x83   : > { %v352_v63 = vsub.f32 %v288_v56, %v320_v57  ;;  %v382_v0 = vmul.f32 %v350_v53, %v350_v53  ;;  %v322_v3 = vld [vmem:[%s1254_s25 + $0x78] sm:$0xff]  ;;  %v353_v4 = vsub.f32 %v289_v61, %v321_v62  ;;  %v323_v8 = vld [vmem:[%s1254_s25 + $0x80] sm:$0xff]  ;;  %v324_v13 = vld [vmem:[%s1254_s25 + $0x88] sm:$0xff] }
  0x84   : > { %v407_v40 = vadd.f32 %v406_v35, %v375_v29  ;;  %v383_v5 = vmul.f32 %v351_v58, %v351_v58  ;;  %v354_v9 = vsub.f32 %v290_v2, %v322_v3  ;;  %v355_v14 = vsub.f32 %v291_v7, %v323_v8  ;;  %v293_v17 = vld [vmem:[%s1248_s27 + $0x90] sm:$0xff]  ;;  %v294_v22 = vld [vmem:[%s1248_s27 + $0x98] sm:$0xff]  ;;  %v295_v27 = vld [vmem:[%s1248_s27 + $0xa0] sm:$0xff] }
  0x85   : > { %v384_v10 = vmul.f32 %v352_v63, %v352_v63  ;;  %v385_v15 = vmul.f32 %v353_v4, %v353_v4  ;;  %v325_v18 = vld [vmem:[%s1254_s25 + $0x90] sm:$0xff]  ;;  %v356_v19 = vsub.f32 %v292_v12, %v324_v13  ;;  %v326_v23 = vld [vmem:[%s1254_s25 + $0x98] sm:$0xff]  ;;  %v327_v28 = vld [vmem:[%s1254_s25 + $0xa0] sm:$0xff] }
  0x86   : > { %v408_v45 = vadd.f32 %v407_v40, %v376_v34  ;;  %v386_v20 = vmul.f32 %v354_v9, %v354_v9  ;;  %v357_v24 = vsub.f32 %v293_v17, %v325_v18  ;;  %v387_v25 = vmul.f32 %v355_v14, %v355_v14  ;;  %v296_v32 = vld [vmem:[%s1248_s27 + $0xa8] sm:$0xff]  ;;  %v297_v37 = vld [vmem:[%s1248_s27 + $0xb0] sm:$0xff]  ;;  %v298_v42 = vld [vmem:[%s1248_s27 + $0xb8] sm:$0xff] }
  0x87   : > { %v358_v29 = vsub.f32 %v294_v22, %v326_v23  ;;  %v388_v30 = vmul.f32 %v356_v19, %v356_v19  ;;  %v328_v33 = vld [vmem:[%s1254_s25 + $0xa8] sm:$0xff]  ;;  %v359_v34 = vsub.f32 %v295_v27, %v327_v28  ;;  %v329_v38 = vld [vmem:[%s1254_s25 + $0xb0] sm:$0xff]  ;;  %v330_v43 = vld [vmem:[%s1254_s25 + $0xb8] sm:$0xff] }
  0x88   : > { %v409_v50 = vadd.f32 %v408_v45, %v377_v39  ;;  %v389_v35 = vmul.f32 %v357_v24, %v357_v24  ;;  %v360_v39 = vsub.f32 %v296_v32, %v328_v33  ;;  %v299_v47 = vld [vmem:[%s1248_s27 + $0xc0] sm:$0xff]  ;;  %v300_v52 = vld [vmem:[%s1248_s27 + $0xc8] sm:$0xff]  ;;  %v301_v57 = vld [vmem:[%s1248_s27 + $0xd0] sm:$0xff] }
  0x89   : > { %v390_v40 = vmul.f32 %v358_v29, %v358_v29  ;;  %v391_v45 = vmul.f32 %v359_v34, %v359_v34  ;;  %v331_v48 = vld [vmem:[%s1254_s25 + $0xc0] sm:$0xff]  ;;  %v332_v53 = vld [vmem:[%s1254_s25 + $0xc8] sm:$0xff]  ;;  %v333_v58 = vld [vmem:[%s1254_s25 + $0xd0] sm:$0xff] }
  0x8a   : > { %v410_v55 = vadd.f32 %v409_v50, %v378_v44  ;;  %v361_v44 = vsub.f32 %v297_v37, %v329_v38  ;;  %v392_v50 = vmul.f32 %v360_v39, %v360_v39  ;;  %v302_v62 = vld [vmem:[%s1248_s27 + $0xd8] sm:$0xff]  ;;  %v303_v3 = vld [vmem:[%s1248_s27 + $0xe0] sm:$0xff]  ;;  %v304_v8 = vld [vmem:[%s1248_s27 + $0xe8] sm:$0xff] }
  0x8b   : > { %v334_v63 = vld [vmem:[%s1254_s25 + $0xd8] sm:$0xff]  ;;  %v335_v4 = vld [vmem:[%s1254_s25 + $0xe0] sm:$0xff]  ;;  %v336_v9 = vld [vmem:[%s1254_s25 + $0xe8] sm:$0xff] }
  0x8c   : > { %v411_v60 = vadd.f32 %v410_v55, %v379_v49  ;;  %v362_v49 = vsub.f32 %v298_v42, %v330_v43  ;;  %v393_v55 = vmul.f32 %v361_v44, %v361_v44  ;;  %v305_v13 = vld [vmem:[%s1248_s27 + $0xf0] sm:$0xff]  ;;  %v306_v18 = vld [vmem:[%s1248_s27 + $0xf8] sm:$0xff] }
  0x8d   : > { %v337_v14 = vld [vmem:[%s1254_s25 + $0xf0] sm:$0xff]  ;;  %v338_v19 = vld [vmem:[%s1254_s25 + $0xf8] sm:$0xff] }
  0x8e   : > { %v412_v1 = vadd.f32 %v411_v60, %v380_v54  ;;  %v363_v54 = vsub.f32 %v299_v47, %v331_v48  ;;  %v394_v60 = vmul.f32 %v362_v49, %v362_v49  ;;  %v370_v23 = vsub.f32 %v306_v18, %v338_v19 }
  0x90   : > { %v413_v6 = vadd.f32 %v412_v1, %v381_v59  ;;  %v364_v59 = vsub.f32 %v300_v52, %v332_v53  ;;  %v395_v1 = vmul.f32 %v363_v54, %v363_v54  ;;  %v402_v28 = vmul.f32 %v370_v23, %v370_v23 }
  0x92   : > { %v414_v11 = vadd.f32 %v413_v6, %v382_v0  ;;  %v365_v0 = vsub.f32 %v301_v57, %v333_v58  ;;  %v396_v6 = vmul.f32 %v364_v59, %v364_v59 }
  0x94   : > { %v415_v16 = vadd.f32 %v414_v11, %v383_v5  ;;  %v366_v5 = vsub.f32 %v302_v62, %v334_v63  ;;  %v397_v11 = vmul.f32 %v365_v0, %v365_v0 }
  0x96   : > { %v416_v21 = vadd.f32 %v415_v16, %v384_v10  ;;  %v367_v10 = vsub.f32 %v303_v3, %v335_v4  ;;  %v398_v16 = vmul.f32 %v366_v5, %v366_v5 }
  0x98   : > { %v417_v26 = vadd.f32 %v416_v21, %v385_v15  ;;  %v368_v15 = vsub.f32 %v304_v8, %v336_v9  ;;  %v399_v21 = vmul.f32 %v367_v10, %v367_v10 }
  0x9a   : > { %v418_v31 = vadd.f32 %v417_v26, %v386_v20  ;;  %v369_v20 = vsub.f32 %v305_v13, %v337_v14  ;;  %v400_v24 = vmul.f32 %v368_v15, %v368_v15 }
  0x9c   : > { %v419_v36 = vadd.f32 %v418_v31, %v387_v25  ;;  %v401_v26 = vmul.f32 %v369_v20, %v369_v20  ;;  %v403_v31 = vld [vmem:[#allocation2] sm:$0xff] }
  0x9e   : > { %v420_v41 = vadd.f32 %v419_v36, %v388_v30 }
  0xa0   : > { %v421_v46 = vadd.f32 %v420_v41, %v389_v35 }
  0xa2   : > { %v422_v51 = vadd.f32 %v421_v46, %v390_v40 }
  0xa4   : > { %v423_v56 = vadd.f32 %v422_v51, %v391_v45 }
  0xa6   : > { %v424_v61 = vadd.f32 %v423_v56, %v392_v50 }
  0xa8   : > { %v425_v2 = vadd.f32 %v424_v61, %v393_v55 }
  0xaa   : > { %v426_v7 = vadd.f32 %v425_v2, %v394_v60 }
  0xac   : > { %v427_v12 = vadd.f32 %v426_v7, %v395_v1 }
  0xae   : > { %v428_v17 = vadd.f32 %v427_v12, %v396_v6 }
  0xb0   : > { %v429_v22 = vadd.f32 %v428_v17, %v397_v11 }
  0xb2   : > { %v430_v25 = vadd.f32 %v429_v22, %v398_v16 }
  0xb4   : > { %v431_v27 = vadd.f32 %v430_v25, %v399_v21 }
  0xb6   : > { %v432_v29 = vadd.f32 %v431_v27, %v400_v24 }
  0xb8   : > { %v433_v30 = vadd.f32 %v432_v29, %v401_v26 }
  0xba   : > { %v434_v32 = vadd.f32 %v433_v30, %v402_v28 }
  0xbc   : > { %v435_v33 = vadd.f32 %v434_v32, %v403_v31 }
  0xbe   : > { %436 = vst [vmem:[#allocation2] sm:$0xff] %v435_v33 }
  0xbf PF: > { %p861_p8 = scmp.le.s32.totalorder %s1264_s26, 562 }
  0xc0   : > { %v536_v34 = vlaneseq (!%p861_p8)  ;;  %v1337_v37 = vstv (!%p861_p8), %s870_s8  ;;  %v440_v39 = vld [vmem:[%s1248_s27] sm:$0xff] (!%p861_p8)  ;;  %v441_v40 = vld [vmem:[%s1248_s27 + $0x8] sm:$0xff] (!%p861_p8)  ;;  %v442_v46 = vld [vmem:[%s1248_s27 + $0x10] sm:$0xff] (!%p861_p8) }
  0xc1   : > { %439 = sbr.rel (%p861_p8) target bundleno = 270 (0x10e), region = 48  ;;  %v472_v41 = vld [vmem:[%s1254_s25] sm:$0xff] (!%p861_p8)  ;;  %v473_v42 = vld [vmem:[%s1254_s25 + $0x8] sm:$0xff] (!%p861_p8)  ;;  %v474_v47 = vld [vmem:[%s1254_s25 + $0x10] sm:$0xff] (!%p861_p8) }
  0xc2   : > { %v1332_v35 = vshrl.u32 (!%p861_p8), %v536_v34, 7  ;;  %v504_v50 = vsub.f32 (!%p861_p8), %v440_v39, %v472_v41  ;;  %v505_v51 = vsub.f32 (!%p861_p8), %v441_v40, %v473_v42  ;;  %v443_v52 = vld [vmem:[%s1248_s27 + $0x18] sm:$0xff] (!%p861_p8)  ;;  %v506_v56 = vsub.f32 (!%p861_p8), %v442_v46, %v474_v47  ;;  %v444_v57 = vld [vmem:[%s1248_s27 + $0x20] sm:$0xff] (!%p861_p8)  ;;  %v445_v0 = vld [vmem:[%s1248_s27 + $0x28] sm:$0xff] (!%p861_p8) }
  0xc3   : > { %v475_v53 = vld [vmem:[%s1254_s25 + $0x18] sm:$0xff] (!%p861_p8)  ;;  %v476_v58 = vld [vmem:[%s1254_s25 + $0x20] sm:$0xff] (!%p861_p8)  ;;  %v477_v1 = vld [vmem:[%s1254_s25 + $0x28] sm:$0xff] (!%p861_p8) }
  0xc4   : > { %v538_v36 = vadd.s32 (!%p861_p8), 8, %v1332_v35  ;;  %v539_v38 = vadd.s32 (!%p861_p8), 16, %v1332_v35  ;;  %v540_v43 = vadd.s32 (!%p861_p8), 24, %v1332_v35  ;;  %v571_v44 = vadd.s32 (!%p861_p8), %v1337_v37, %v1332_v35  ;;  %v446_v7 = vld [vmem:[%s1248_s27 + $0x30] sm:$0xff] (!%p861_p8)  ;;  %v447_v14 = vld [vmem:[%s1248_s27 + $0x38] sm:$0xff] (!%p861_p8)  ;;  %v448_v22 = vld [vmem:[%s1248_s27 + $0x40] sm:$0xff] (!%p861_p8) }
  0xc5   : > { %v541_v48 = vadd.s32 (!%p861_p8), 32, %v1332_v35  ;;  %v542_v54 = vadd.s32 (!%p861_p8), 40, %v1332_v35  ;;  %v543_v59 = vadd.s32 (!%p861_p8), 48, %v1332_v35  ;;  %v507_v61 = vsub.f32 (!%p861_p8), %v443_v52, %v475_v53  ;;  %v478_v8 = vld [vmem:[%s1254_s25 + $0x30] sm:$0xff] (!%p861_p8)  ;;  %v479_v15 = vld [vmem:[%s1254_s25 + $0x38] sm:$0xff] (!%p861_p8)  ;;  %v480_v23 = vld [vmem:[%s1254_s25 + $0x40] sm:$0xff] (!%p861_p8) }
  0xc6   : > { %v572_v45 = vadd.s32 (!%p861_p8), %v1337_v37, %v538_v36  ;;  %v573_v49 = vadd.s32 (!%p861_p8), %v1337_v37, %v539_v38  ;;  %v574_v55 = vadd.s32 (!%p861_p8), %v1337_v37, %v540_v43  ;;  %vm603_vm0 = vcmp.lt.s32.totalorder (!%p861_p8), %v571_v44, 562  ;;  %v449_v30 = vld [vmem:[%s1248_s27 + $0x48] sm:$0xff] (!%p861_p8)  ;;  %v450_v40 = vld [vmem:[%s1248_s27 + $0x50] sm:$0xff] (!%p861_p8) }
  0xc7   : > { %v575_v60 = vadd.s32 (!%p861_p8), %v1337_v37, %v541_v48  ;;  %v635_v62 = vsel (!%p861_p8), %vm603_vm0, %v504_v50, 0.0  ;;  %v544_v2 = vadd.s32 (!%p861_p8), 56, %v1332_v35  ;;  %v576_v3 = vadd.s32 (!%p861_p8), %v1337_v37, %v542_v54  ;;  %v481_v31 = vld [vmem:[%s1254_s25 + $0x48] sm:$0xff] (!%p861_p8)  ;;  %v482_v41 = vld [vmem:[%s1254_s25 + $0x50] sm:$0xff] (!%p861_p8)  ;;  %v451_v48 = vld [vmem:[%s1248_s27 + $0x58] sm:$0xff] (!%p861_p8) }
  0xc8   : > { %vm604_vm1 = vcmp.lt.s32.totalorder %v572_v45, 562  ;;  %vm605_vm2 = vcmp.lt.s32.totalorder %v573_v49, 562  ;;  %vm606_vm3 = vcmp.lt.s32.totalorder %v574_v55, 562  ;;  %v508_v4 = vsub.f32 %v444_v57, %v476_v58  ;;  %v483_v49 = vld [vmem:[%s1254_s25 + $0x58] sm:$0xff]  ;;  %v484_v57 = vld [vmem:[%s1254_s25 + $0x60] sm:$0xff] }
  0xc9   : > { %v636_v63 = vsel %vm604_vm1, %v505_v51, 0.0  ;;  %v545_v5 = vadd.s32 64, %v1332_v35  ;;  %v637_v6 = vsel %vm605_vm2, %v506_v56, 0.0  ;;  %v577_v9 = vadd.s32 %v1337_v37, %v543_v59  ;;  %v452_v56 = vld [vmem:[%s1248_s27 + $0x60] sm:$0xff] }
  0xca   : > { %vm607_vm4 = vcmp.lt.s32.totalorder %v575_v60, 562  ;;  %v667_v10 = vmul.f32 %v635_v62, %v635_v62  ;;  %v668_v11 = vmul.f32 %v636_v63, %v636_v63  ;;  %v509_v12 = vsub.f32 %v445_v0, %v477_v1  ;;  %v453_v0 = vld [vmem:[%s1248_s27 + $0x68] sm:$0xff] }
  0xcb   : > { %v638_v13 = vsel %vm606_vm3, %v507_v61, 0.0  ;;  %v546_v16 = vadd.s32 72, %v1332_v35  ;;  %v578_v17 = vadd.s32 %v1337_v37, %v544_v2  ;;  %vm608_vm5 = vcmp.lt.s32.totalorder %v576_v3, 562  ;;  %v485_v1 = vld [vmem:[%s1254_s25 + $0x68] sm:$0xff] }
  0xcc   : > { %v669_v18 = vmul.f32 %v637_v6, %v637_v6  ;;  %v510_v19 = vsub.f32 %v446_v7, %v478_v8  ;;  %v547_v20 = vadd.s32 80, %v1332_v35  ;;  %v639_v21 = vsel %vm607_vm4, %v508_v4, 0.0  ;;  %v454_v8 = vld [vmem:[%s1248_s27 + $0x70] sm:$0xff] }
  0xcd   : > { %v579_v24 = vadd.s32 %v1337_v37, %v545_v5  ;;  %vm609_vm6 = vcmp.lt.s32.totalorder %v577_v9, 562  ;;  %v670_v25 = vmul.f32 %v638_v13, %v638_v13  ;;  %v700_v26 = vadd.f32 %v668_v11, %v667_v10  ;;  %v486_v9 = vld [vmem:[%s1254_s25 + $0x70] sm:$0xff] }
  0xce   : > { %v511_v27 = vsub.f32 %v447_v14, %v479_v15  ;;  %v548_v28 = vadd.s32 88, %v1332_v35  ;;  %v640_v29 = vsel %vm608_vm5, %v509_v12, 0.0  ;;  %v580_v32 = vadd.s32 %v1337_v37, %v546_v16  ;;  %v455_v16 = vld [vmem:[%s1248_s27 + $0x78] sm:$0xff] }
  0xcf   : > { %vm610_vm7 = vcmp.lt.s32.totalorder %v578_v17, 562  ;;  %v671_v33 = vmul.f32 %v639_v21, %v639_v21  ;;  %v701_v34 = vadd.f32 %v700_v26, %v669_v18  ;;  %v512_v36 = vsub.f32 %v448_v22, %v480_v23  ;;  %v487_v17 = vld [vmem:[%s1254_s25 + $0x78] sm:$0xff] }
  0xd0   : > { %v549_v38 = vadd.s32 96, %v1332_v35  ;;  %v641_v39 = vsel %vm609_vm6, %v510_v19, 0.0  ;;  %v581_v42 = vadd.s32 %v1337_v37, %v547_v20  ;;  %vm611_vm8 = vcmp.lt.s32.totalorder %v579_v24, 562  ;;  %v456_v24 = vld [vmem:[%s1248_s27 + $0x80] sm:$0xff] }
  0xd1   : > { %v672_v43 = vmul.f32 %v640_v29, %v640_v29  ;;  %v702_v44 = vadd.f32 %v701_v34, %v670_v25  ;;  %v513_v45 = vsub.f32 %v449_v30, %v481_v31  ;;  %v550_v46 = vadd.s32 104, %v1332_v35  ;;  %v488_v25 = vld [vmem:[%s1254_s25 + $0x80] sm:$0xff] }
  0xd2   : > { %v642_v47 = vsel %vm610_vm7, %v511_v27, 0.0  ;;  %v582_v50 = vadd.s32 %v1337_v37, %v548_v28  ;;  %vm612_vm9 = vcmp.lt.s32.totalorder %v580_v32, 562  ;;  %v673_v51 = vmul.f32 %v641_v39, %v641_v39  ;;  %v457_v32 = vld [vmem:[%s1248_s27 + $0x88] sm:$0xff] }
  0xd3   : > { %v703_v52 = vadd.f32 %v702_v44, %v671_v33  ;;  %v514_v53 = vsub.f32 %v450_v40, %v482_v41  ;;  %v551_v54 = vadd.s32 112, %v1332_v35  ;;  %v643_v55 = vsel %vm611_vm8, %v512_v36, 0.0  ;;  %v489_v33 = vld [vmem:[%s1254_s25 + $0x88] sm:$0xff] }
  0xd4   : > { %v583_v58 = vadd.s32 %v1337_v37, %v549_v38  ;;  %vm613_vm10 = vcmp.lt.s32.totalorder %v581_v42, 562  ;;  %v674_v59 = vmul.f32 %v642_v47, %v642_v47  ;;  %v515_v61 = vsub.f32 %v451_v48, %v483_v49  ;;  %v458_v42 = vld [vmem:[%s1248_s27 + $0x90] sm:$0xff] }
  0xd5   : > { %v704_v60 = vadd.f32 %v703_v52, %v672_v43  ;;  %v552_v62 = vadd.s32 120, %v1332_v35  ;;  %v644_v63 = vsel %vm612_vm9, %v513_v45, 0.0  ;;  %v584_v2 = vadd.s32 %v1337_v37, %v550_v46  ;;  %v490_v43 = vld [vmem:[%s1254_s25 + $0x90] sm:$0xff] }
  0xd6   : > { %vm614_vm11 = vcmp.lt.s32.totalorder %v582_v50, 562  ;;  %v675_v3 = vmul.f32 %v643_v55, %v643_v55  ;;  %v516_v5 = vsub.f32 %v452_v56, %v484_v57  ;;  %v553_v6 = vadd.s32 128, %v1332_v35  ;;  %v459_v50 = vld [vmem:[%s1248_s27 + $0x98] sm:$0xff] }
  0xd7   : > { %v705_v4 = vadd.f32 %v704_v60, %v673_v51  ;;  %v645_v7 = vsel %vm613_vm10, %v514_v53, 0.0  ;;  %v585_v10 = vadd.s32 %v1337_v37, %v551_v54  ;;  %vm615_vm12 = vcmp.lt.s32.totalorder %v583_v58, 562  ;;  %v491_v51 = vld [vmem:[%s1254_s25 + $0x98] sm:$0xff]  ;;  %v460_v58 = vld [vmem:[%s1248_s27 + $0xa0] sm:$0xff] }
  0xd8   : > { %v676_v11 = vmul.f32 %v644_v63, %v644_v63  ;;  %v517_v13 = vsub.f32 %v453_v0, %v485_v1  ;;  %v554_v14 = vadd.s32 136, %v1332_v35  ;;  %v646_v15 = vsel %vm614_vm11, %v515_v61, 0.0 }
  0xd9   : > { %v706_v12 = vadd.f32 %v705_v4, %v674_v59  ;;  %v586_v18 = vadd.s32 %v1337_v37, %v552_v62  ;;  %vm616_vm13 = vcmp.lt.s32.totalorder %v584_v2, 562  ;;  %v677_v19 = vmul.f32 %v645_v7, %v645_v7  ;;  %v492_v59 = vld [vmem:[%s1254_s25 + $0xa0] sm:$0xff]  ;;  %v461_v2 = vld [vmem:[%s1248_s27 + $0xa8] sm:$0xff] }
  0xda   : > { %v518_v21 = vsub.f32 %v454_v8, %v486_v9  ;;  %v555_v22 = vadd.s32 144, %v1332_v35  ;;  %v647_v23 = vsel %vm615_vm12, %v516_v5, 0.0  ;;  %v587_v26 = vadd.s32 %v1337_v37, %v553_v6 }
  0xdb   : > { %v707_v20 = vadd.f32 %v706_v12, %v675_v3  ;;  %vm617_vm14 = vcmp.lt.s32.totalorder %v585_v10, 562  ;;  %v678_v27 = vmul.f32 %v646_v15, %v646_v15  ;;  %v519_v29 = vsub.f32 %v455_v16, %v487_v17  ;;  %v493_v3 = vld [vmem:[%s1254_s25 + $0xa8] sm:$0xff]  ;;  %v462_v10 = vld [vmem:[%s1248_s27 + $0xb0] sm:$0xff] }
  0xdc   : > { %v556_v30 = vadd.s32 152, %v1332_v35  ;;  %v648_v31 = vsel %vm616_vm13, %v517_v13, 0.0  ;;  %v588_v34 = vadd.s32 %v1337_v37, %v554_v14  ;;  %vm618_vm15 = vcmp.lt.s32.totalorder %v586_v18, 562  ;;  %v463_v18 = vld [vmem:[%s1248_s27 + $0xb8] sm:$0xff] }
  0xdd   : > { %v708_v28 = vadd.f32 %v707_v20, %v676_v11  ;;  %v679_v36 = vmul.f32 %v647_v23, %v647_v23  ;;  %v520_v39 = vsub.f32 %v456_v24, %v488_v25  ;;  %v557_v40 = vadd.s32 160, %v1332_v35  ;;  %v494_v11 = vld [vmem:[%s1254_s25 + $0xb0] sm:$0xff] }
  0xde   : > { %v649_v41 = vsel %vm617_vm14, %v518_v21, 0.0  ;;  %v589_v44 = vadd.s32 %v1337_v37, %v555_v22  ;;  %vm619_vm0 = vcmp.lt.s32.totalorder %v587_v26, 562  ;;  %v680_v45 = vmul.f32 %v648_v31, %v648_v31  ;;  %v464_v26 = vld [vmem:[%s1248_s27 + $0xc0] sm:$0xff] }
  0xdf   : > { %v709_v38 = vadd.f32 %v708_v28, %v677_v19  ;;  %v521_v47 = vsub.f32 %v457_v32, %v489_v33  ;;  %v558_v48 = vadd.s32 168, %v1332_v35  ;;  %v650_v49 = vsel %vm618_vm15, %v519_v29, 0.0  ;;  %v495_v19 = vld [vmem:[%s1254_s25 + $0xb8] sm:$0xff] }
  0xe0   : > { %v590_v52 = vadd.s32 %v1337_v37, %v556_v30  ;;  %vm620_vm1 = vcmp.lt.s32.totalorder %v588_v34, 562  ;;  %v681_v53 = vmul.f32 %v649_v41, %v649_v41  ;;  %v522_v55 = vsub.f32 %v458_v42, %v490_v43  ;;  %v465_v34 = vld [vmem:[%s1248_s27 + $0xc8] sm:$0xff] }
  0xe1   : > { %v710_v46 = vadd.f32 %v709_v38, %v678_v27  ;;  %v559_v56 = vadd.s32 176, %v1332_v35  ;;  %v651_v57 = vsel %vm619_vm0, %v520_v39, 0.0  ;;  %v591_v60 = vadd.s32 %v1337_v37, %v557_v40  ;;  %v496_v27 = vld [vmem:[%s1254_s25 + $0xc0] sm:$0xff] }
  0xe2   : > { %vm621_vm2 = vcmp.lt.s32.totalorder %v589_v44, 562  ;;  %v682_v61 = vmul.f32 %v650_v49, %v650_v49  ;;  %v523_v63 = vsub.f32 %v459_v50, %v491_v51  ;;  %v560_v0 = vadd.s32 184, %v1332_v35  ;;  %v466_v44 = vld [vmem:[%s1248_s27 + $0xd0] sm:$0xff] }
  0xe3   : > { %v711_v54 = vadd.f32 %v710_v46, %v679_v36  ;;  %v652_v1 = vsel %vm620_vm1, %v521_v47, 0.0  ;;  %v592_v4 = vadd.s32 %v1337_v37, %v558_v48  ;;  %vm622_vm3 = vcmp.lt.s32.totalorder %v590_v52, 562  ;;  %v497_v36 = vld [vmem:[%s1254_s25 + $0xc8] sm:$0xff]  ;;  %v467_v52 = vld [vmem:[%s1248_s27 + $0xd8] sm:$0xff] }
  0xe4   : > { %v683_v5 = vmul.f32 %v651_v57, %v651_v57  ;;  %v524_v7 = vsub.f32 %v460_v58, %v492_v59  ;;  %v561_v8 = vadd.s32 192, %v1332_v35  ;;  %v653_v9 = vsel %vm621_vm2, %v522_v55, 0.0 }
  0xe5   : > { %v712_v62 = vadd.f32 %v711_v54, %v680_v45  ;;  %v593_v12 = vadd.s32 %v1337_v37, %v559_v56  ;;  %vm623_vm4 = vcmp.lt.s32.totalorder %v591_v60, 562  ;;  %v684_v13 = vmul.f32 %v652_v1, %v652_v1  ;;  %v498_v45 = vld [vmem:[%s1254_s25 + $0xd0] sm:$0xff]  ;;  %v468_v60 = vld [vmem:[%s1248_s27 + $0xe0] sm:$0xff] }
  0xe6   : > { %v525_v15 = vsub.f32 %v461_v2, %v493_v3  ;;  %v562_v16 = vadd.s32 200, %v1332_v35  ;;  %v654_v17 = vsel %vm622_vm3, %v523_v63, 0.0  ;;  %v594_v20 = vadd.s32 %v1337_v37, %v560_v0 }
  0xe7   : > { %v713_v6 = vadd.f32 %v712_v62, %v681_v53  ;;  %vm624_vm5 = vcmp.lt.s32.totalorder %v592_v4, 562  ;;  %v685_v21 = vmul.f32 %v653_v9, %v653_v9  ;;  %v526_v23 = vsub.f32 %v462_v10, %v494_v11  ;;  %v499_v53 = vld [vmem:[%s1254_s25 + $0xd8] sm:$0xff]  ;;  %v469_v4 = vld [vmem:[%s1248_s27 + $0xe8] sm:$0xff]  ;;  %v470_v11 = vld [vmem:[%s1248_s27 + $0xf0] sm:$0xff] }
  0xe8   : > { %v563_v24 = vadd.s32 208, %v1332_v35  ;;  %v655_v25 = vsel %vm623_vm4, %v524_v7, 0.0  ;;  %v595_v28 = vadd.s32 %v1337_v37, %v561_v8  ;;  %vm625_vm6 = vcmp.lt.s32.totalorder %v593_v12, 562  ;;  %v502_v12 = vld [vmem:[%s1254_s25 + $0xf0] sm:$0xff] }
  0xe9   : > { %v714_v14 = vadd.f32 %v713_v6, %v682_v61  ;;  %v686_v29 = vmul.f32 %v654_v17, %v654_v17  ;;  %v527_v31 = vsub.f32 %v463_v18, %v495_v19  ;;  %v564_v32 = vadd.s32 216, %v1332_v35  ;;  %v500_v61 = vld [vmem:[%s1254_s25 + $0xe0] sm:$0xff]  ;;  %v471_v17 = vld [vmem:[%s1248_s27 + $0xf8] sm:$0xff] }
  0xea   : > { %v656_v33 = vsel %vm624_vm5, %v525_v15, 0.0  ;;  %v596_v38 = vadd.s32 %v1337_v37, %v562_v16  ;;  %vm626_vm7 = vcmp.lt.s32.totalorder %v594_v20, 562  ;;  %v687_v39 = vmul.f32 %v655_v25, %v655_v25  ;;  %v503_v18 = vld [vmem:[%s1254_s25 + $0xf8] sm:$0xff] }
  0xeb   : > { %v715_v22 = vadd.f32 %v714_v14, %v683_v5  ;;  %v528_v41 = vsub.f32 %v464_v26, %v496_v27  ;;  %v565_v42 = vadd.s32 224, %v1332_v35  ;;  %v657_v43 = vsel %vm625_vm6, %v526_v23, 0.0  ;;  %v501_v5 = vld [vmem:[%s1254_s25 + $0xe8] sm:$0xff] }
  0xec   : > { %v597_v46 = vadd.s32 %v1337_v37, %v563_v24  ;;  %vm627_vm8 = vcmp.lt.s32.totalorder %v595_v28, 562  ;;  %v688_v47 = vmul.f32 %v656_v33, %v656_v33  ;;  %v529_v49 = vsub.f32 %v465_v34, %v497_v36 }
  0xed   : > { %v716_v30 = vadd.f32 %v715_v22, %v684_v13  ;;  %v566_v50 = vadd.s32 232, %v1332_v35  ;;  %v658_v51 = vsel %vm626_vm7, %v527_v31, 0.0  ;;  %v598_v54 = vadd.s32 %v1337_v37, %v564_v32 }
  0xee   : > { %vm628_vm9 = vcmp.lt.s32.totalorder %v596_v38, 562  ;;  %v689_v55 = vmul.f32 %v657_v43, %v657_v43  ;;  %v530_v57 = vsub.f32 %v466_v44, %v498_v45  ;;  %v567_v58 = vadd.s32 240, %v1332_v35 }
  0xef   : > { %v717_v40 = vadd.f32 %v716_v30, %v685_v21  ;;  %v659_v59 = vsel %vm627_vm8, %v528_v41, 0.0  ;;  %v599_v62 = vadd.s32 %v1337_v37, %v565_v42  ;;  %vm629_vm10 = vcmp.lt.s32.totalorder %v597_v46, 562 }
  0xf0   : > { %v690_v63 = vmul.f32 %v658_v51, %v658_v51  ;;  %v531_v1 = vsub.f32 %v467_v52, %v499_v53  ;;  %v568_v2 = vadd.s32 248, %v1332_v35  ;;  %v660_v3 = vsel %vm628_vm9, %v529_v49, 0.0 }
  0xf1   : > { %v718_v48 = vadd.f32 %v717_v40, %v686_v29  ;;  %v600_v6 = vadd.s32 %v1337_v37, %v566_v50  ;;  %vm630_vm11 = vcmp.lt.s32.totalorder %v598_v54, 562  ;;  %v691_v7 = vmul.f32 %v659_v59, %v659_v59  ;;  %v699_v40 = vld [vmem:[#allocation2] sm:$0xff] }
  0xf2   : > { %v532_v9 = vsub.f32 %v468_v60, %v500_v61  ;;  %v661_v10 = vsel %vm629_vm10, %v530_v57, 0.0  ;;  %v601_v13 = vadd.s32 %v1337_v37, %v567_v58  ;;  %vm631_vm12 = vcmp.lt.s32.totalorder %v599_v62, 562 }
  0xf3   : > { %v719_v56 = vadd.f32 %v718_v48, %v687_v39  ;;  %v692_v14 = vmul.f32 %v660_v3, %v660_v3  ;;  %v533_v35 = vsub.f32 %v469_v4, %v501_v5  ;;  %v662_v16 = vsel %vm630_vm11, %v531_v1, 0.0 }
  0xf4   : > { %v602_v19 = vadd.s32 %v1337_v37, %v568_v2  ;;  %vm632_vm13 = vcmp.lt.s32.totalorder %v600_v6, 562  ;;  %v693_v20 = vmul.f32 %v661_v10, %v661_v10  ;;  %v534_v22 = vsub.f32 %v470_v11, %v502_v12 }
  0xf5   : > { %v720_v0 = vadd.f32 %v719_v56, %v688_v47  ;;  %v663_v23 = vsel %vm631_vm12, %v532_v9, 0.0  ;;  %vm633_vm14 = vcmp.lt.s32.totalorder %v601_v13, 562  ;;  %v694_v24 = vmul.f32 %v662_v16, %v662_v16 }
  0xf6   : > { %v535_v26 = vsub.f32 %v471_v17, %v503_v18  ;;  %v664_v27 = vsel %vm632_vm13, %v533_v35, 0.0  ;;  %vm634_vm15 = vcmp.lt.s32.totalorder %v602_v19, 562  ;;  %v695_v28 = vmul.f32 %v663_v23, %v663_v23 }
  0xf7   : > { %v721_v8 = vadd.f32 %v720_v0, %v689_v55  ;;  %v665_v30 = vsel %vm633_vm14, %v534_v22, 0.0  ;;  %v696_v31 = vmul.f32 %v664_v27, %v664_v27 }
  0xf8   : > { %v666_v33 = vsel %vm634_vm15, %v535_v26, 0.0  ;;  %v697_v34 = vmul.f32 %v665_v30, %v665_v30 }
  0xf9   : > { %v722_v15 = vadd.f32 %v721_v8, %v690_v63  ;;  %v698_v37 = vmul.f32 %v666_v33, %v666_v33 }
  0xfb   : > { %v723_v21 = vadd.f32 %v722_v15, %v691_v7 }
  0xfd   : > { %v724_v25 = vadd.f32 %v723_v21, %v692_v14 }
  0xff   : > { %v725_v29 = vadd.f32 %v724_v25, %v693_v20 }
 0x101   : > { %v726_v32 = vadd.f32 %v725_v29, %v694_v24 }
 0x103   : > { %v727_v36 = vadd.f32 %v726_v32, %v695_v28 }
 0x105   : > { %v728_v38 = vadd.f32 %v727_v36, %v696_v31 }
 0x107   : > { %v729_v39 = vadd.f32 %v728_v38, %v697_v34 }
 0x109   : > { %v730_v41 = vadd.f32 %v729_v39, %v698_v37 }
 0x10b   : > { %v731_v42 = vadd.f32 %v730_v41, %v699_v40 }
 0x10d   : > { %732 = vst [vmem:[#allocation2] sm:$0xff] %v731_v42 }
 0x10e PF: > { %p863_p2 = scmp.ne.s32.totalorder %s1066_s12, 2 }
 0x110   : > { %736 = sbr.rel (%p863_p2) target bundleno = 290 (0x122), region = 52 }
 0x114   : > { %v737_v43 = vld [vmem:[#allocation2] sm:$0xff] (!%p863_p2) }
 0x115   : > { %v738_v44 = vrot.slane (!%p863_p2), %v737_v43, 4 }
 0x117   : > { %v739_v45 = vadd.f32 %v738_v44, %v737_v43 }
 0x119   : > { %v740_v46 = vrot.slane %v739_v45, 2 }
 0x11b   : > { %v741_v47 = vadd.f32 %v740_v46, %v739_v45 }
 0x11d   : > { %v742_v48 = vrot.slane %v741_v47, 1 }
 0x11f   : > { %v743_v49 = vadd.f32 %v742_v48, %v741_v47 }
 0x121   : > { %744 = vst [vmem:[#allocation8] sm:$0x1] %v743_v49 }
 0x122 PF: > { %p1469_p3 = scmp.eq.s32.totalorder %s838_s16, 2  ;;  %s1083_s29 = smov [#allocation8]  }
 0x123   : > { %s754_s3 = sshll.u32 %s1083_s29, 4  ;;  %s755_s3 = int_to_ptr.vmem [resolvable:$true] %s754_s3 }
 0x124   : > { %s990_s12 = scalar_lea.vmem %s755_s3, 16  ;;  %s996_s17 = scalar_lea.vmem %s755_s3, 32 }
 0x125   : > { %p991_p4 = scmp.ne.s32.totalorder %s755_s3, %s990_s12  ;;  %p997_p5 = scmp.lt.s32.totalorder %s755_s3, %s755_s3 }
 0x126   : > { %p998_p9 = scmp.lt.s32.totalorder %s996_s17, %s990_s12 }
 0x127   : > { %p992_p1 = pnand %p991_p4, %p1469_p3 }
 0x128   : > { %p999_p10 = por %p998_p9, %p997_p5 }
 0x129   : > { %p993_p12 = pneg %p992_p1 }
 0x12b   : > { %p1000_p6 = pnand %p999_p10, %p993_p12 }
 0x12d   : > { %1003 = shalt.err (!%p1000_p6)
}
 0x12e   : > { %s1004_s5 = scalar_lea.hbm %s1515_s2, 16 }
 0x12f   : > { %p1005_p11 = scmp.ne.s32.totalorder %s1515_s2, %s1004_s5  ;;  %p1010_p0 = scmp.lt.u32.totalorder %s1004_s5, %s1515_s2 }
 0x131   : > { %p1006_p13 = pnand %p1005_p11, %p1469_p3 }
 0x133   : > { %p1007_p7 = pneg %p1006_p13 }
 0x135   : > { %p1012_p8 = pnand %p1010_p0, %p1007_p7 }
 0x137   : > { %1015 = shalt.err (!%p1012_p8)
}
 0x138   : > { %875 = dma.vmem_to_hbm [thread:$0]  (%p1469_p3), %s755_s3, 16, %s1515_s2, [#allocation5]  }
 0x139   : > { %1049 = dma.done.wait (%p1469_p3), [#allocation5], 16  }
 0x13a   : > { %1051 = vsyncadd (%p1469_p3), [#allocation5], 4294967280 }
 0x13b PF: > { %s19_s14 = sadd.s32 1, %s1074_s14   ;;  %s1519_s9 = smov %s1058_s10 }
 0x13c   : > { %p16_p2 = scmp.ge.s32.totalorder %s19_s14, 5   ;;  %s1520_s10 = smov %s1062_s11 }
 0x13d   : > { %s1521_s11 = smov %s1154_s23  ;;  %s1522_s12 = smov %s1070_s13 }
 0x13e   : > { %s1523_s13 = smov %s1525_s15  ;;  %18 = sbr.rel (!%p16_p2) target bundleno = 7 (0x7), region = 95 }
 0x145   :  { %767 = vsyncpa [#allocation4], 1 }
 0x146   :  { %769 = vsyncpa [#allocation4 + $0x1], 1 }
 0x147   :  { %770 = vsyncpa [#allocation7], 1 }
 0x148   :  { %772 = vsyncpa [#allocation7 + $0x1], 1 }
 0x149   :  { %773 = vsyncpa [#allocation5], 1 }
 0x14a   :  { %775 = vsyncpa [#allocation5 + $0x1], 1 }

</bundles_post_ra>
